<compile_context>
chip_gen: v5e
topology: v5e:2x2
jax: 0.10.0
libtpu: 0.0.40
codegen_flags: <defaults>
</compile_context>

<pallas_src>
import jax
import jax.numpy as jnp
from jax.experimental import pallas as pl
from jax.experimental.pallas import tpu as pltpu


# ---------------------------------------------------------------------------
# Parameter construction (mirrors the PyTorch ParameterList exactly)
# ---------------------------------------------------------------------------
def init_learner_params(config, key):
    """PyTorch-layout params: [w (out_f, in_f) kaiming_normal_, b (out_f,) zeros, ...]."""
    params = []
    for name, param in config:
        if name == "Linear":
            in_f, out_f = int(param[0]), int(param[1])
            key, sub = jax.random.split(key)
            std = (2.0 / in_f) ** 0.5  # kaiming_normal_: mode=fan_in, gain=sqrt(2)
            w = std * jax.random.normal(sub, (out_f, in_f), dtype=jnp.float32)
            b = jnp.zeros((out_f,), dtype=jnp.float32)
            params += [w, b]
    return params


def prepare_params(config, params):
    """One-time prep: transpose W to (in_f, out_f) so the kernel does jnp.dot(x, w)
    with no in-kernel transpose; biases stored as (1, out_f). No padding — the
    kernel operates on exact shapes and Mosaic masks the sub-tile dims."""
    ws, bs = [], []
    idx = 0
    for name, _param in config:
        if name == "Linear":
            w, b = params[idx], params[idx + 1]
            ws.append(jnp.asarray(w, jnp.float32).T)            # (in_f, out_f)
            bs.append(jnp.asarray(b, jnp.float32).reshape(1, -1))  # (1, out_f)
            idx += 2
    return tuple(ws), tuple(bs)


# ---------------------------------------------------------------------------
# Kernels
# ---------------------------------------------------------------------------
def _fused_mlp_kernel(*refs):
    # refs = (x_ref, w0, b0, w1, b1, ..., o_ref); layer loop statically unrolled.
    x_ref, o_ref = refs[0], refs[-1]
    num_layers = (len(refs) - 2) // 2
    h = x_ref[...].astype(jnp.float32)          # features.float() happens on-chip
    for i in range(num_layers):
        w = refs[1 + 2 * i][...]                # (in_f, out_f), pre-transposed
        b = refs[2 + 2 * i][...]                # (1, out_f)
        h = jnp.dot(h, w, preferred_element_type=jnp.float32) + b
    o_ref[...] = h                              # exact (n, out_f) — no wrapper slice


def _single_layer_kernel(x_ref, w_ref, b_ref, o_ref):
    o_ref[...] = (
        jnp.dot(x_ref[...].astype(jnp.float32), w_ref[...],
                preferred_element_type=jnp.float32)
        + b_ref[...]
    )


# ---------------------------------------------------------------------------
# VMEM budgeting
# ---------------------------------------------------------------------------
def _vmem_budget_bytes():
    try:
        cap = int(pltpu.get_tpu_info().vmem_capacity_bytes)
    except Exception:
        cap = 64 * 1024 * 1024  # conservative: v7x has 64 MiB per TensorCore
    return int(cap * 0.75)      # ~25% headroom for compiler-internal scratch


def _fused_vmem_estimate(features, ws, bs):
    n = features.shape[0]
    nbytes = int(features.size) * features.dtype.itemsize
    for w, b in zip(ws, bs):
        nbytes += int(w.size) * 4 + int(b.size) * 4
    widths = [features.shape[1]] + [int(w.shape[1]) for w in ws]
    nbytes += 2 * n * max(widths) * 4  # two live f32 activations at widest point
    return nbytes


# ---------------------------------------------------------------------------
# Forward (matches Learner.forward semantics)
# ---------------------------------------------------------------------------
def make_learner_forward(config):
    num_layers = sum(1 for name, _ in config if name == "Linear")
    vmem_spec = pl.BlockSpec(memory_space=pltpu.MemorySpace.VMEM)
    budget = _vmem_budget_bytes()

    def _fused_call(features, ws, bs, vmem_limit):
        n = features.shape[0]
        out_f = ws[-1].shape[1]
        inputs = [features]
        for w, b in zip(ws, bs):
            inputs += [w, b]
        return pl.pallas_call(
            _fused_mlp_kernel,
            out_shape=jax.ShapeDtypeStruct((n, out_f), jnp.float32),
            in_specs=[vmem_spec] * len(inputs),
            out_specs=vmem_spec,
            compiler_params=pltpu.CompilerParams(vmem_limit_bytes=vmem_limit),
        )(*inputs)

    def _layerwise_call(features, ws, bs, vmem_limit):
        # Streamed fallback: one layer's weights resident at a time; the
        # activation round-trips HBM between layers.
        h = features
        for w, b in zip(ws, bs):
            n = h.shape[0]
            h = pl.pallas_call(
                _single_layer_kernel,
                out_shape=jax.ShapeDtypeStruct((n, w.shape[1]), jnp.float32),
                in_specs=[vmem_spec] * 3,
                out_specs=vmem_spec,
                compiler_params=pltpu.CompilerParams(vmem_limit_bytes=vmem_limit),
            )(h, w, b)
        return h

    @jax.jit
    def forward(features, ws, bs):
        assert len(ws) == num_layers and len(bs) == num_layers
        est = _fused_vmem_estimate(features, ws, bs)
        slack = 4 * 1024 * 1024
        if est + slack <= budget:
            vmem_limit = min(budget, max(est + slack, 16 * 1024 * 1024))
            return _fused_call(features, ws, bs, vmem_limit)
        return _layerwise_call(features, ws, bs, budget)

    return forward


# ---------------------------------------------------------------------------
# Pure-JAX reference (uses the original, unpadded PyTorch-layout params)
# ---------------------------------------------------------------------------
def learner_forward_ref(config, features, params):
    h = features.astype(jnp.float32)
    idx = 0
    for name, _ in config:
        if name == "Linear":
            w, b = params[idx], params[idx + 1]
            h = h @ w.T + b
            idx += 2
    return h


if __name__ == "__main__":
    # Small synthetic config: 32 -> 64 -> 16 (two Linear layers).
    config = (("Linear", (32, 64)), ("Linear", (64, 16)))

    key = jax.random.PRNGKey(0)
    key_params, key_x = jax.random.split(key)

    params = init_learner_params(config, key_params)
    ws, bs = prepare_params(config, params)

    batch = 8
    features = jax.random.normal(key_x, (batch, 32), dtype=jnp.float32)

    forward = make_learner_forward(config)
    out = jax.block_until_ready(forward(features, ws, bs))

    ref = learner_forward_ref(config, features, params)
    assert out.shape == (batch, 16), out.shape
    assert out.dtype == jnp.float32, out.dtype
    assert jnp.allclose(out, ref, atol=1e-4, rtol=1e-4), "mismatch vs reference"

    print("KERNEL_OK")
</pallas_src>

<mosaic_0001>
module attributes {stable_mosaic.version = 11 : i64} {
  func.func @_fused_mlp_kernel(%arg0: memref<8x32xf32, #tpu.memory_space<vmem>>, %arg1: memref<32x64xf32, #tpu.memory_space<vmem>>, %arg2: memref<1x64xf32, #tpu.memory_space<vmem>>, %arg3: memref<64x16xf32, #tpu.memory_space<vmem>>, %arg4: memref<1x16xf32, #tpu.memory_space<vmem>>, %arg5: memref<8x16xf32, #tpu.memory_space<vmem>>) attributes {dimension_semantics = [], scalar_prefetch = 0 : i64, scratch_operands = 0 : i64, tpu.core_type = #tpu.core_type<tc>} {
    %c0 = arith.constant 0 : index
    %c0_0 = arith.constant 0 : index
    %0 = vector.load %arg0[%c0, %c0_0] : memref<8x32xf32, #tpu.memory_space<vmem>>, vector<8x32xf32>
    %c0_1 = arith.constant 0 : index
    %c0_2 = arith.constant 0 : index
    %1 = vector.load %arg1[%c0_1, %c0_2] : memref<32x64xf32, #tpu.memory_space<vmem>>, vector<32x64xf32>
    %c0_3 = arith.constant 0 : index
    %c0_4 = arith.constant 0 : index
    %2 = vector.load %arg2[%c0_3, %c0_4] : memref<1x64xf32, #tpu.memory_space<vmem>>, vector<1x64xf32>
    %cst = arith.constant dense<0.000000e+00> : vector<8x64xf32>
    %3 = tpu.matmul %0, %1, %cst {dimension_numbers = #tpu.dot_dimension_numbers<[1], [0], [0], [1], [0, 0, 1, 1], [], []>} : vector<8x32xf32>, vector<32x64xf32>, vector<8x64xf32> -> vector<8x64xf32>
    %4 = vector.broadcast %2 : vector<1x64xf32> to vector<8x64xf32>
    %5 = arith.addf %3, %4 : vector<8x64xf32>
    %c0_5 = arith.constant 0 : index
    %c0_6 = arith.constant 0 : index
    %6 = vector.load %arg3[%c0_5, %c0_6] : memref<64x16xf32, #tpu.memory_space<vmem>>, vector<64x16xf32>
    %c0_7 = arith.constant 0 : index
    %c0_8 = arith.constant 0 : index
    %7 = vector.load %arg4[%c0_7, %c0_8] : memref<1x16xf32, #tpu.memory_space<vmem>>, vector<1x16xf32>
    %cst_9 = arith.constant dense<0.000000e+00> : vector<8x16xf32>
    %8 = tpu.matmul %5, %6, %cst_9 {dimension_numbers = #tpu.dot_dimension_numbers<[1], [0], [0], [1], [0, 0, 1, 1], [], []>} : vector<8x64xf32>, vector<64x16xf32>, vector<8x16xf32> -> vector<8x16xf32>
    %9 = vector.broadcast %7 : vector<1x16xf32> to vector<8x16xf32>
    %10 = arith.addf %8, %9 : vector<8x16xf32>
    %c0_10 = arith.constant 0 : index
    %c0_11 = arith.constant 0 : index
    %11 = vector.load %arg5[%c0_10, %c0_11] : memref<8x16xf32, #tpu.memory_space<vmem>>, vector<8x16xf32>
    tpu.vector_store %arg5[%c0_10, %c0_11], %10 {strides = array<i32>} : memref<8x16xf32, #tpu.memory_space<vmem>>, vector<8x16xf32>,
    return
  }
}

</mosaic_0001>

<bundles_post_ra>
// kernel: forward.1
= control target key start
LH: loop header
LB: loop body
LE: loop exit
PB: predicated region body
PF: predicated region fallthrough
CT: control target
= control target key end

     0   :  { %s218_s0 = inlined_call_operand.vmem [shape: f32[8,32], index: 0, kind: input, shape index: {}]   ;;  %s219_s1 = inlined_call_operand.vmem [shape: f32[32,64], index: 1, kind: input, shape index: {}]   ;;  %s220_s2 = inlined_call_operand.vmem [shape: f32[1,64], index: 2, kind: input, shape index: {}]   ;;  %s221_s3 = inlined_call_operand.vmem [shape: f32[64,16], index: 3, kind: input, shape index: {}]   ;;  %s222_s4 = inlined_call_operand.vmem [shape: f32[1,16], index: 4, kind: input, shape index: {}]   ;;  %s223_s5 = inlined_call_operand.hbm [shape: f32[8,16], index: 5, kind: output, shape index: {}]  }
   0x1   :  { %v25_v0 = vld [vmem:[%s219_s1 + $0x18] sm:$0xff]  ;;  %v24_v1 = vld [vmem:[%s219_s1 + $0x10] sm:$0xff]  ;;  %v23_v3 = vld [vmem:[%s219_s1 + $0x8] sm:$0xff] }
   0x2   :  { %46 = vmatpush.msra.mxu0 %v25_v0  ;;  %v61_v2 = vld [vmem:[%s221_s3 + $0x38] sm:$0xff]  ;;  %v60_v4 = vld [vmem:[%s221_s3 + $0x30] sm:$0xff]  ;;  %v59_v5 = vld [vmem:[%s221_s3 + $0x28] sm:$0xff] }
   0x3   :  { %78 = vmatpush.msra.mxu1 %v61_v2  ;;  %v22_v6 = vld [vmem:[%s219_s1] sm:$0xff] }
   0x4   :  { %47 = vmatpush.msra.mxu0 %v24_v1 }
   0x5   :  { %79 = vmatpush.msra.mxu1 %v60_v4 }
   0x6   :  { %10 = vsyncpa [#allocation3], 0  ;;  %48 = vmatpush.msra.mxu0 %v23_v3  ;;  %v21_v7 = vld [vmem:[%s218_s0] sm:$0xff]  ;;  %vm30_vm0 = vcmask 261120   ;;  %v57_v9 = vld [vmem:[%s221_s3 + $0x18] sm:$0xff]  ;;  %vm66_vm1 = vcmask 523264  }
   0x7   :  { %v58_v8 = vld [vmem:[%s221_s3 + $0x20] sm:$0xff]  ;;  %80 = vmatpush.msra.mxu1 %v59_v5  ;;  %v56_v10 = vld [vmem:[%s221_s3 + $0x10] sm:$0xff]  ;;  %v55_v11 = vld [vmem:[%s221_s3 + $0x8] sm:$0xff]  ;;  %s139_s21 = smov [#allocation2]   ;;  %s99_s25 = sshll.u32 %s223_s5, 4  ;;  %vm90_vm2 = vcmask 130048   ;;  %s100_s25 = int_to_ptr.hbm [resolvable:$true] %s99_s25 }
   0x8   :  { %49 = vmatpush.msra.mxu0 %v22_v6  ;;  %v54_v12 = vld [vmem:[%s221_s3] sm:$0xff]  ;;  %s97_s22 = sshll.u32 %s139_s21, 4  ;;  %s98_s22 = int_to_ptr.vmem [resolvable:$true] %s97_s22 }
   0x9   :  { %108 = vmatmul.msk.f32.vlgmr.msra.gmra.mxu0 %vm30_vm0, %v21_v7  ;;  %81 = vmatpush.msra.mxu1 %v58_v8  ;;  %v111_v13 = vld [vmem:[%s220_s2] ss:$0 sm:$0xff] }
   0xa   :  { %v112_v16 = vld [vmem:[%s222_s4] ss:$0 sm:$0xff] }
   0xb   :  { %82 = vmatpush.msra.mxu1 %v57_v9 }
   0xd   :  { %83 = vmatpush.msra.mxu1 %v56_v10 }
   0xf   :  { %84 = vmatpush.msra.mxu1 %v55_v11 }
  0x11   :  { %85 = vmatpush.msra.mxu1 %v54_v12 }
  0x86   :  { %v51_v14 = vpop.f32.mrf.mxu0 }
  0x87   :  { %v52_v15 = vadd.f32 %v111_v13, %v51_v14 }
  0x89   :  { %109 = vmatmul.msk.f32.vlgmr.msra.gmra.mxu1 %vm66_vm1, %v52_v15 }
 0x106   :  { %v87_v17 = vpop.f32.mrf.mxu1 }
 0x107   :  { %v88_v18 = vadd.f32 %v112_v16, %v87_v17 }
 0x109   :  { %91 = vst.msk [vmem:[#allocation2] sm:$0xff] %vm90_vm2, %v88_v18 }
 0x10a   :  { %102 = dma.vmem_to_hbm [thread:$0]  %s98_s22, 128, %s100_s25, [#allocation3]  }
 0x10b   :  { %137 = dma.done.wait [#allocation3], 128  }
 0x10c   :  { %138 = vsyncadd [#allocation3], 4294967168 }
 0x10d   :  { %107 = vsyncpa [#allocation3], 1 }

</bundles_post_ra>
